<compile_context>
chip_gen: v7x
topology: tpu7x:2x2x1
jax: 0.10.0
libtpu: 0.0.40
codegen_flags: <defaults>
</compile_context>

<pallas_src>
import numpy as np
import jax
import jax.numpy as jnp
from jax.experimental import pallas as pl
from jax.experimental.pallas import tpu as pltpu


# ----------------------------------------------------------------------------
# Module setup (mirrors TpsGridGen.__init__) -- plain numpy, deterministic.
# ----------------------------------------------------------------------------
def make_tps_constants(out_h, out_w, grid_size=3):
    grid_X, grid_Y = np.meshgrid(
        np.linspace(-1.0, 1.0, out_w), np.linspace(-1.0, 1.0, out_h)
    )
    grid_X = grid_X.astype(np.float32)  # (H, W) pixel x coords in [-1, 1]
    grid_Y = grid_Y.astype(np.float32)  # (H, W) pixel y coords in [-1, 1]

    axis_coords = np.linspace(-1.0, 1.0, grid_size)
    N = grid_size * grid_size
    P_Y, P_X = np.meshgrid(axis_coords, axis_coords)
    P_X = np.reshape(P_X, (-1,)).astype(np.float32)  # (N,)
    P_Y = np.reshape(P_Y, (-1,)).astype(np.float32)  # (N,)

    # compute_L_inverse (constant, theta-independent).
    # TODO(synk): torch.inverse has no in-kernel Pallas equivalent; done once on the host.
    px64 = P_X.astype(np.float64)
    py64 = P_Y.astype(np.float64)
    Xm = np.broadcast_to(px64[:, None], (N, N))
    Ym = np.broadcast_to(py64[:, None], (N, N))
    P_dist_squared = (Xm - Xm.T) ** 2 + (Ym - Ym.T) ** 2
    P_dist_squared = np.where(P_dist_squared == 0.0, 1.0, P_dist_squared)
    K = P_dist_squared * np.log(P_dist_squared)
    O = np.ones((N, 1), np.float64)
    Z = np.zeros((3, 3), np.float64)
    Pmat = np.concatenate((O, px64[:, None], py64[:, None]), axis=1)
    L = np.concatenate(
        (np.concatenate((K, Pmat), axis=1), np.concatenate((Pmat.T, Z), axis=1)), axis=0
    )
    Li32 = np.linalg.inv(L).astype(np.float32)  # (N+3, N+3), f32 like the torch module

    # Theta-independent basis over all pixels (flattened HW lane axis):
    #   PhiT = [U_1 .. U_N, 1, x, y],  U_i(p) = d2*log(d2) with d2==0 -> 1.
    gx = grid_X.reshape(-1).astype(np.float64)
    gy = grid_Y.reshape(-1).astype(np.float64)
    dx = gx[None, :] - px64[:, None]
    dy = gy[None, :] - py64[:, None]
    d2 = dx * dx + dy * dy
    d2 = np.where(d2 == 0.0, 1.0, d2)
    U = d2 * np.log(d2)                                   # (N, HW)
    PhiT32 = np.concatenate(
        [U, np.ones((1, gx.size)), gx[None, :], gy[None, :]], axis=0
    ).astype(np.float32)                                   # (N+3, HW), f32-rounded

    # Fold the theta-independent half of the TPS solve into the basis
    # (inputs f32-rounded like the torch module, fold accumulated in f64):
    #   out[c,p] = sum_n (theta[c,n] + P_c[n]) * PhiLi[n,p]
    #   PhiLi    = Li[:, :N]^T @ PhiT          (N,   HW)
    #   base_c   = P_c @ PhiLi                 (identity warp)
    PhiLi = Li32[:, :N].astype(np.float64).T @ PhiT32.astype(np.float64)   # (N, HW)
    base_x = px64 @ PhiLi                                                  # (HW,)
    base_y = py64 @ PhiLi
    G = np.concatenate([PhiLi, base_x[None, :], base_y[None, :]], axis=0)  # (N+2, HW)
    G = G.astype(np.float32)

    # Pad the flattened pixel axis to a multiple of 8*128 and reshape so the
    # kernel sees a dense (rows, 128) lane layout (no divisibility hazards).
    HW = out_h * out_w
    HW_pad = -(-HW // 1024) * 1024
    Gp = np.zeros((N + 2, HW_pad), np.float32)
    Gp[:, :HW] = G
    Gp = Gp.reshape(N + 2, HW_pad // 128, 128)             # (N+2, R, 128)

    return {
        "N": N,
        "grid_X": grid_X,
        "grid_Y": grid_Y,
        "P_X": P_X,
        "P_Y": P_Y,
        "Li": Li32,
        "G": Gp,
    }


# ----------------------------------------------------------------------------
# Pallas kernel: VPU contraction over the precomputed, Li-folded basis.
# ----------------------------------------------------------------------------
def _tps_warp_kernel(theta_ref, g_ref, out_ref):
    # theta_ref: SMEM (B, 2N)            theta[:, :N] -> x offsets, [:, N:] -> y
    # g_ref    : VMEM (N+2, Tr, 128)     rows 0..N-1 = PhiLi, row N = base_x, N+1 = base_y
    # out_ref  : VMEM (2B, Tr, 128)      rows 0..B-1 = x' planes, B..2B-1 = y' planes
    batch = theta_ref.shape[0]
    n_basis = theta_ref.shape[1] // 2
    for coord in range(2):                              # 0 -> x', 1 -> y'
        for b in range(batch):
            acc = g_ref[n_basis + coord]                # identity warp (theta == 0 term)
            for n in range(n_basis):                    # K broadcast mul-adds on the VPU
                acc = acc + theta_ref[b, coord * n_basis + n] * g_ref[n]
            out_ref[coord * batch + b] = acc


def _choose_tile_rows(num_rows, rows_in, rows_out, *,
                      vmem_budget_bytes=6 << 20, target_steps=2):
    """Pick a multiple-of-8 row tile: big enough for ~target_steps grid steps
    (>=2 keeps v7x megacore engaged), small enough that the double-buffered
    working set stays under the VMEM budget (safe on v5e/v6e/v7x defaults)."""
    bytes_per_row = (rows_in + rows_out) * 128 * 4
    max_rows = max(8, (vmem_budget_bytes // (2 * bytes_per_row)) // 8 * 8)
    want = -(-num_rows // target_steps)                 # cdiv
    want = max(8, ((want + 7) // 8) * 8)
    return int(min(max_rows, want, num_rows))


def tps_grid_gen(theta, consts, *, vmem_budget_bytes=6 << 20, target_steps=2):
    """theta: (B, 2N) float32 -> warped grid (B, H, W, 2) float32."""
    N = consts["N"]
    H, W = consts["grid_X"].shape
    HW = H * W
    G = consts["G"]                                     # (N+2, R, 128) numpy f32
    R = G.shape[1]
    B = int(theta.shape[0])

    theta = jnp.asarray(theta, jnp.float32).reshape(B, 2 * N)
    g = jnp.asarray(G)

    tile_r = _choose_tile_rows(R, N + 2, 2 * B,
                               vmem_budget_bytes=vmem_budget_bytes,
                               target_steps=target_steps)
    grid = (pl.cdiv(R, tile_r),)

    cost = pl.CostEstimate(
        flops=2 * (2 * B) * N * R * 128,
        transcendentals=0,
        bytes_accessed=4 * ((N + 2) * R * 128 + (2 * B) * R * 128 + B * 2 * N),
    )

    out = pl.pallas_call(
        _tps_warp_kernel,
        out_shape=jax.ShapeDtypeStruct((2 * B, R, 128), jnp.float32),
        grid=grid,
        in_specs=[
            pl.BlockSpec(memory_space=pltpu.MemorySpace.SMEM),        # theta (tiny)
            pl.BlockSpec((N + 2, tile_r, 128), lambda t: (0, t, 0)),  # basis row tile
        ],
        out_specs=pl.BlockSpec((2 * B, tile_r, 128), lambda t: (0, t, 0)),
        compiler_params=pltpu.CompilerParams(
            dimension_semantics=("parallel",),          # independent pixel tiles
        ),
        cost_estimate=cost,
    )(theta, g)

    # (2B, R, 128) -> (B, H, W, 2), matching torch.cat((X', Y'), dim=3).
    # NOTE(perf): this coord-last relayout (minor dim of 2) is the only
    # remaining non-kernel cost; consumers that accept a channel-major grid
    # should use `out` (2B, R, 128) / (2, B, H, W) directly and skip it.
    out = out.reshape(2, B, R * 128)[:, :, :HW].reshape(2, B, H, W)
    return jnp.transpose(out, (1, 2, 3, 0))


# ----------------------------------------------------------------------------
# Pure-JAX reference (mirrors TpsGridGen.apply_transformation) for validation.
# ----------------------------------------------------------------------------
def tps_reference(theta, consts):
    N = consts["N"]
    px = jnp.asarray(consts["P_X"], jnp.float32)       # (N,)
    py = jnp.asarray(consts["P_Y"], jnp.float32)       # (N,)
    li = jnp.asarray(consts["Li"], jnp.float32)        # (N+3, N+3)
    gx = jnp.asarray(consts["grid_X"], jnp.float32)    # (H, W)
    gy = jnp.asarray(consts["grid_Y"], jnp.float32)    # (H, W)
    theta = jnp.asarray(theta, jnp.float32)
    hp = jax.lax.Precision.HIGHEST

    qx = theta[:, :N] + px[None, :]                    # (B, N)
    qy = theta[:, N:] + py[None, :]
    wa_x = jnp.dot(qx, li[:, :N].T, precision=hp)      # (B, N+3)
    wa_y = jnp.dot(qy, li[:, :N].T, precision=hp)

    dx = gx[None, :, :, None] - px[None, None, None, :]
    dy = gy[None, :, :, None] - py[None, None, None, :]
    d2 = dx * dx + dy * dy
    d2 = jnp.where(d2 == 0.0, 1.0, d2)
    u = d2 * jnp.log(d2)                               # (1, H, W, N)

    def warp(wa):
        aff = (wa[:, None, None, N]
               + wa[:, None, None, N + 1] * gx[None]
               + wa[:, None, None, N + 2] * gy[None])
        rbf = jnp.sum(wa[:, None, None, :N] * u, axis=-1)
        return aff + rbf

    return jnp.stack([warp(wa_x), warp(wa_y)], axis=3)


if __name__ == "__main__":
    # Small shapes: 16x128 output grid, 3x3 TPS control grid (N=9), batch 2.
    out_h, out_w, grid_size = 16, 128, 3
    consts = make_tps_constants(out_h, out_w, grid_size)
    N = consts["N"]

    key = jax.random.PRNGKey(0)
    B = 2
    theta = 0.1 * jax.random.normal(key, (B, 2 * N), dtype=jnp.float32)

    out = jax.block_until_ready(tps_grid_gen(theta, consts))
    ref = jax.block_until_ready(tps_reference(theta, consts))

    assert out.shape == (B, out_h, out_w, 2), out.shape
    # Kernel folds Li into the basis in f64 (from f32-rounded inputs), so it
    # differs from the two-stage f32 reference only by accumulation-order noise.
    np.testing.assert_allclose(np.asarray(out), np.asarray(ref),
                               rtol=1e-5, atol=5e-5)
    print("KERNEL_OK")
</pallas_src>

<mosaic_0001>
module attributes {stable_mosaic.version = 11 : i64} {
  func.func @_tps_warp_kernel(%arg0: i32, %arg1: memref<2x18xf32, #tpu.memory_space<smem>>, %arg2: memref<11x8x128xf32, #tpu.memory_space<vmem>>, %arg3: memref<4x8x128xf32, #tpu.memory_space<vmem>>) attributes {dimension_semantics = [#tpu.dimension_semantics<parallel>], iteration_bounds = array<i64: 2>, scalar_prefetch = 0 : i64, scratch_operands = 0 : i64, tpu.core_type = #tpu.core_type<tc>, window_params = [{transform_indices = @transform_0, window_bounds = array<i64: 2, 18>}, {transform_indices = @transform_1, window_bounds = array<i64: 11, 8, 128>}, {transform_indices = @transform_2, window_bounds = array<i64: 4, 8, 128>}]} {
    %c9 = arith.constant 9 : index
    %c0 = arith.constant 0 : index
    %c0_0 = arith.constant 0 : index
    %0 = vector.load %arg2[%c9, %c0, %c0_0] : memref<11x8x128xf32, #tpu.memory_space<vmem>>, vector<1x8x128xf32>
    %1 = vector.shape_cast %0 : vector<1x8x128xf32> to vector<8x128xf32>
    %c0_1 = arith.constant 0 : index
    %c0_2 = arith.constant 0 : index
    %2 = memref.load %arg1[%c0_1, %c0_2] : memref<2x18xf32, #tpu.memory_space<smem>>
    %c0_3 = arith.constant 0 : index
    %c0_4 = arith.constant 0 : index
    %c0_5 = arith.constant 0 : index
    %3 = vector.load %arg2[%c0_3, %c0_4, %c0_5] : memref<11x8x128xf32, #tpu.memory_space<vmem>>, vector<1x8x128xf32>
    %4 = vector.shape_cast %3 : vector<1x8x128xf32> to vector<8x128xf32>
    %5 = vector.broadcast %2 : f32 to vector<8x128xf32>
    %6 = arith.mulf %5, %4 : vector<8x128xf32>
    %7 = arith.addf %1, %6 : vector<8x128xf32>
    %c0_6 = arith.constant 0 : index
    %c1 = arith.constant 1 : index
    %8 = memref.load %arg1[%c0_6, %c1] : memref<2x18xf32, #tpu.memory_space<smem>>
    %c1_7 = arith.constant 1 : index
    %c0_8 = arith.constant 0 : index
    %c0_9 = arith.constant 0 : index
    %9 = vector.load %arg2[%c1_7, %c0_8, %c0_9] : memref<11x8x128xf32, #tpu.memory_space<vmem>>, vector<1x8x128xf32>
    %10 = vector.shape_cast %9 : vector<1x8x128xf32> to vector<8x128xf32>
    %11 = vector.broadcast %8 : f32 to vector<8x128xf32>
    %12 = arith.mulf %11, %10 : vector<8x128xf32>
    %13 = arith.addf %7, %12 : vector<8x128xf32>
    %c0_10 = arith.constant 0 : index
    %c2 = arith.constant 2 : index
    %14 = memref.load %arg1[%c0_10, %c2] : memref<2x18xf32, #tpu.memory_space<smem>>
    %c2_11 = arith.constant 2 : index
    %c0_12 = arith.constant 0 : index
    %c0_13 = arith.constant 0 : index
    %15 = vector.load %arg2[%c2_11, %c0_12, %c0_13] : memref<11x8x128xf32, #tpu.memory_space<vmem>>, vector<1x8x128xf32>
    %16 = vector.shape_cast %15 : vector<1x8x128xf32> to vector<8x128xf32>
    %17 = vector.broadcast %14 : f32 to vector<8x128xf32>
    %18 = arith.mulf %17, %16 : vector<8x128xf32>
    %19 = arith.addf %13, %18 : vector<8x128xf32>
    %c0_14 = arith.constant 0 : index
    %c3 = arith.constant 3 : index
    %20 = memref.load %arg1[%c0_14, %c3] : memref<2x18xf32, #tpu.memory_space<smem>>
    %c3_15 = arith.constant 3 : index
    %c0_16 = arith.constant 0 : index
    %c0_17 = arith.constant 0 : index
    %21 = vector.load %arg2[%c3_15, %c0_16, %c0_17] : memref<11x8x128xf32, #tpu.memory_space<vmem>>, vector<1x8x128xf32>
    %22 = vector.shape_cast %21 : vector<1x8x128xf32> to vector<8x128xf32>
    %23 = vector.broadcast %20 : f32 to vector<8x128xf32>
    %24 = arith.mulf %23, %22 : vector<8x128xf32>
    %25 = arith.addf %19, %24 : vector<8x128xf32>
    %c0_18 = arith.constant 0 : index
    %c4 = arith.constant 4 : index
    %26 = memref.load %arg1[%c0_18, %c4] : memref<2x18xf32, #tpu.memory_space<smem>>
    %c4_19 = arith.constant 4 : index
    %c0_20 = arith.constant 0 : index
    %c0_21 = arith.constant 0 : index
    %27 = vector.load %arg2[%c4_19, %c0_20, %c0_21] : memref<11x8x128xf32, #tpu.memory_space<vmem>>, vector<1x8x128xf32>
    %28 = vector.shape_cast %27 : vector<1x8x128xf32> to vector<8x128xf32>
    %29 = vector.broadcast %26 : f32 to vector<8x128xf32>
    %30 = arith.mulf %29, %28 : vector<8x128xf32>
    %31 = arith.addf %25, %30 : vector<8x128xf32>
    %c0_22 = arith.constant 0 : index
    %c5 = arith.constant 5 : index
    %32 = memref.load %arg1[%c0_22, %c5] : memref<2x18xf32, #tpu.memory_space<smem>>
    %c5_23 = arith.constant 5 : index
    %c0_24 = arith.constant 0 : index
    %c0_25 = arith.constant 0 : index
    %33 = vector.load %arg2[%c5_23, %c0_24, %c0_25] : memref<11x8x128xf32, #tpu.memory_space<vmem>>, vector<1x8x128xf32>
    %34 = vector.shape_cast %33 : vector<1x8x128xf32> to vector<8x128xf32>
    %35 = vector.broadcast %32 : f32 to vector<8x128xf32>
    %36 = arith.mulf %35, %34 : vector<8x128xf32>
    %37 = arith.addf %31, %36 : vector<8x128xf32>
    %c0_26 = arith.constant 0 : index
    %c6 = arith.constant 6 : index
    %38 = memref.load %arg1[%c0_26, %c6] : memref<2x18xf32, #tpu.memory_space<smem>>
    %c6_27 = arith.constant 6 : index
    %c0_28 = arith.constant 0 : index
    %c0_29 = arith.constant 0 : index
    %39 = vector.load %arg2[%c6_27, %c0_28, %c0_29] : memref<11x8x128xf32, #tpu.memory_space<vmem>>, vector<1x8x128xf32>
    %40 = vector.shape_cast %39 : vector<1x8x128xf32> to vector<8x128xf32>
    %41 = vector.broadcast %38 : f32 to vector<8x128xf32>
    %42 = arith.mulf %41, %40 : vector<8x128xf32>
    %43 = arith.addf %37, %42 : vector<8x128xf32>
    %c0_30 = arith.constant 0 : index
    %c7 = arith.constant 7 : index
    %44 = memref.load %arg1[%c0_30, %c7] : memref<2x18xf32, #tpu.memory_space<smem>>
    %c7_31 = arith.constant 7 : index
    %c0_32 = arith.constant 0 : index
    %c0_33 = arith.constant 0 : index
    %45 = vector.load %arg2[%c7_31, %c0_32, %c0_33] : memref<11x8x128xf32, #tpu.memory_space<vmem>>, vector<1x8x128xf32>
    %46 = vector.shape_cast %45 : vector<1x8x128xf32> to vector<8x128xf32>
    %47 = vector.broadcast %44 : f32 to vector<8x128xf32>
    %48 = arith.mulf %47, %46 : vector<8x128xf32>
    %49 = arith.addf %43, %48 : vector<8x128xf32>
    %c0_34 = arith.constant 0 : index
    %c8 = arith.constant 8 : index
    %50 = memref.load %arg1[%c0_34, %c8] : memref<2x18xf32, #tpu.memory_space<smem>>
    %c8_35 = arith.constant 8 : index
    %c0_36 = arith.constant 0 : index
    %c0_37 = arith.constant 0 : index
    %51 = vector.load %arg2[%c8_35, %c0_36, %c0_37] : memref<11x8x128xf32, #tpu.memory_space<vmem>>, vector<1x8x128xf32>
    %52 = vector.shape_cast %51 : vector<1x8x128xf32> to vector<8x128xf32>
    %53 = vector.broadcast %50 : f32 to vector<8x128xf32>
    %54 = arith.mulf %53, %52 : vector<8x128xf32>
    %55 = arith.addf %49, %54 : vector<8x128xf32>
    %c0_38 = arith.constant 0 : index
    %c0_39 = arith.constant 0 : index
    %c0_40 = arith.constant 0 : index
    %56 = vector.load %arg3[%c0_38, %c0_39, %c0_40] : memref<4x8x128xf32, #tpu.memory_space<vmem>>, vector<1x8x128xf32>
    %57 = vector.shape_cast %56 : vector<1x8x128xf32> to vector<8x128xf32>
    %58 = vector.shape_cast %55 : vector<8x128xf32> to vector<1x8x128xf32>
    tpu.vector_store %arg3[%c0_38, %c0_39, %c0_40], %58 {strides = array<i32>} : memref<4x8x128xf32, #tpu.memory_space<vmem>>, vector<1x8x128xf32>,
    %c9_41 = arith.constant 9 : index
    %c0_42 = arith.constant 0 : index
    %c0_43 = arith.constant 0 : index
    %59 = vector.load %arg2[%c9_41, %c0_42, %c0_43] : memref<11x8x128xf32, #tpu.memory_space<vmem>>, vector<1x8x128xf32>
    %60 = vector.shape_cast %59 : vector<1x8x128xf32> to vector<8x128xf32>
    %c1_44 = arith.constant 1 : index
    %c0_45 = arith.constant 0 : index
    %61 = memref.load %arg1[%c1_44, %c0_45] : memref<2x18xf32, #tpu.memory_space<smem>>
    %c0_46 = arith.constant 0 : index
    %c0_47 = arith.constant 0 : index
    %c0_48 = arith.constant 0 : index
    %62 = vector.load %arg2[%c0_46, %c0_47, %c0_48] : memref<11x8x128xf32, #tpu.memory_space<vmem>>, vector<1x8x128xf32>
    %63 = vector.shape_cast %62 : vector<1x8x128xf32> to vector<8x128xf32>
    %64 = vector.broadcast %61 : f32 to vector<8x128xf32>
    %65 = arith.mulf %64, %63 : vector<8x128xf32>
    %66 = arith.addf %60, %65 : vector<8x128xf32>
    %c1_49 = arith.constant 1 : index
    %c1_50 = arith.constant 1 : index
    %67 = memref.load %arg1[%c1_49, %c1_50] : memref<2x18xf32, #tpu.memory_space<smem>>
    %c1_51 = arith.constant 1 : index
    %c0_52 = arith.constant 0 : index
    %c0_53 = arith.constant 0 : index
    %68 = vector.load %arg2[%c1_51, %c0_52, %c0_53] : memref<11x8x128xf32, #tpu.memory_space<vmem>>, vector<1x8x128xf32>
    %69 = vector.shape_cast %68 : vector<1x8x128xf32> to vector<8x128xf32>
    %70 = vector.broadcast %67 : f32 to vector<8x128xf32>
    %71 = arith.mulf %70, %69 : vector<8x128xf32>
    %72 = arith.addf %66, %71 : vector<8x128xf32>
    %c1_54 = arith.constant 1 : index
    %c2_55 = arith.constant 2 : index
    %73 = memref.load %arg1[%c1_54, %c2_55] : memref<2x18xf32, #tpu.memory_space<smem>>
    %c2_56 = arith.constant 2 : index
    %c0_57 = arith.constant 0 : index
    %c0_58 = arith.constant 0 : index
    %74 = vector.load %arg2[%c2_56, %c0_57, %c0_58] : memref<11x8x128xf32, #tpu.memory_space<vmem>>, vector<1x8x128xf32>
    %75 = vector.shape_cast %74 : vector<1x8x128xf32> to vector<8x128xf32>
    %76 = vector.broadcast %73 : f32 to vector<8x128xf32>
    %77 = arith.mulf %76, %75 : vector<8x128xf32>
    %78 = arith.addf %72, %77 : vector<8x128xf32>
    %c1_59 = arith.constant 1 : index
    %c3_60 = arith.constant 3 : index
    %79 = memref.load %arg1[%c1_59, %c3_60] : memref<2x18xf32, #tpu.memory_space<smem>>
    %c3_61 = arith.constant 3 : index
    %c0_62 = arith.constant 0 : index
    %c0_63 = arith.constant 0 : index
    %80 = vector.load %arg2[%c3_61, %c0_62, %c0_63] : memref<11x8x128xf32, #tpu.memory_space<vmem>>, vector<1x8x128xf32>
    %81 = vector.shape_cast %80 : vector<1x8x128xf32> to vector<8x128xf32>
    %82 = vector.broadcast %79 : f32 to vector<8x128xf32>
    %83 = arith.mulf %82, %81 : vector<8x128xf32>
    %84 = arith.addf %78, %83 : vector<8x128xf32>
    %c1_64 = arith.constant 1 : index
    %c4_65 = arith.constant 4 : index
    %85 = memref.load %arg1[%c1_64, %c4_65] : memref<2x18xf32, #tpu.memory_space<smem>>
    %c4_66 = arith.constant 4 : index
    %c0_67 = arith.constant 0 : index
    %c0_68 = arith.constant 0 : index
    %86 = vector.load %arg2[%c4_66, %c0_67, %c0_68] : memref<11x8x128xf32, #tpu.memory_space<vmem>>, vector<1x8x128xf32>
    %87 = vector.shape_cast %86 : vector<1x8x128xf32> to vector<8x128xf32>
    %88 = vector.broadcast %85 : f32 to vector<8x128xf32>
    %89 = arith.mulf %88, %87 : vector<8x128xf32>
    %90 = arith.addf %84, %89 : vector<8x128xf32>
    %c1_69 = arith.constant 1 : index
    %c5_70 = arith.constant 5 : index
    %91 = memref.load %arg1[%c1_69, %c5_70] : memref<2x18xf32, #tpu.memory_space<smem>>
    %c5_71 = arith.constant 5 : index
    %c0_72 = arith.constant 0 : index
    %c0_73 = arith.constant 0 : index
    %92 = vector.load %arg2[%c5_71, %c0_72, %c0_73] : memref<11x8x128xf32, #tpu.memory_space<vmem>>, vector<1x8x128xf32>
    %93 = vector.shape_cast %92 : vector<1x8x128xf32> to vector<8x128xf32>
    %94 = vector.broadcast %91 : f32 to vector<8x128xf32>
    %95 = arith.mulf %94, %93 : vector<8x128xf32>
    %96 = arith.addf %90, %95 : vector<8x128xf32>
    %c1_74 = arith.constant 1 : index
    %c6_75 = arith.constant 6 : index
    %97 = memref.load %arg1[%c1_74, %c6_75] : memref<2x18xf32, #tpu.memory_space<smem>>
    %c6_76 = arith.constant 6 : index
    %c0_77 = arith.constant 0 : index
    %c0_78 = arith.constant 0 : index
    %98 = vector.load %arg2[%c6_76, %c0_77, %c0_78] : memref<11x8x128xf32, #tpu.memory_space<vmem>>, vector<1x8x128xf32>
    %99 = vector.shape_cast %98 : vector<1x8x128xf32> to vector<8x128xf32>
    %100 = vector.broadcast %97 : f32 to vector<8x128xf32>
    %101 = arith.mulf %100, %99 : vector<8x128xf32>
    %102 = arith.addf %96, %101 : vector<8x128xf32>
    %c1_79 = arith.constant 1 : index
    %c7_80 = arith.constant 7 : index
    %103 = memref.load %arg1[%c1_79, %c7_80] : memref<2x18xf32, #tpu.memory_space<smem>>
    %c7_81 = arith.constant 7 : index
    %c0_82 = arith.constant 0 : index
    %c0_83 = arith.constant 0 : index
    %104 = vector.load %arg2[%c7_81, %c0_82, %c0_83] : memref<11x8x128xf32, #tpu.memory_space<vmem>>, vector<1x8x128xf32>
    %105 = vector.shape_cast %104 : vector<1x8x128xf32> to vector<8x128xf32>
    %106 = vector.broadcast %103 : f32 to vector<8x128xf32>
    %107 = arith.mulf %106, %105 : vector<8x128xf32>
    %108 = arith.addf %102, %107 : vector<8x128xf32>
    %c1_84 = arith.constant 1 : index
    %c8_85 = arith.constant 8 : index
    %109 = memref.load %arg1[%c1_84, %c8_85] : memref<2x18xf32, #tpu.memory_space<smem>>
    %c8_86 = arith.constant 8 : index
    %c0_87 = arith.constant 0 : index
    %c0_88 = arith.constant 0 : index
    %110 = vector.load %arg2[%c8_86, %c0_87, %c0_88] : memref<11x8x128xf32, #tpu.memory_space<vmem>>, vector<1x8x128xf32>
    %111 = vector.shape_cast %110 : vector<1x8x128xf32> to vector<8x128xf32>
    %112 = vector.broadcast %109 : f32 to vector<8x128xf32>
    %113 = arith.mulf %112, %111 : vector<8x128xf32>
    %114 = arith.addf %108, %113 : vector<8x128xf32>
    %c1_89 = arith.constant 1 : index
    %c0_90 = arith.constant 0 : index
    %c0_91 = arith.constant 0 : index
    %115 = vector.load %arg3[%c1_89, %c0_90, %c0_91] : memref<4x8x128xf32, #tpu.memory_space<vmem>>, vector<1x8x128xf32>
    %116 = vector.shape_cast %115 : vector<1x8x128xf32> to vector<8x128xf32>
    %117 = vector.shape_cast %114 : vector<8x128xf32> to vector<1x8x128xf32>
    tpu.vector_store %arg3[%c1_89, %c0_90, %c0_91], %117 {strides = array<i32>} : memref<4x8x128xf32, #tpu.memory_space<vmem>>, vector<1x8x128xf32>,
    %c10 = arith.constant 10 : index
    %c0_92 = arith.constant 0 : index
    %c0_93 = arith.constant 0 : index
    %118 = vector.load %arg2[%c10, %c0_92, %c0_93] : memref<11x8x128xf32, #tpu.memory_space<vmem>>, vector<1x8x128xf32>
    %119 = vector.shape_cast %118 : vector<1x8x128xf32> to vector<8x128xf32>
    %c0_94 = arith.constant 0 : index
    %c9_95 = arith.constant 9 : index
    %120 = memref.load %arg1[%c0_94, %c9_95] : memref<2x18xf32, #tpu.memory_space<smem>>
    %c0_96 = arith.constant 0 : index
    %c0_97 = arith.constant 0 : index
    %c0_98 = arith.constant 0 : index
    %121 = vector.load %arg2[%c0_96, %c0_97, %c0_98] : memref<11x8x128xf32, #tpu.memory_space<vmem>>, vector<1x8x128xf32>
    %122 = vector.shape_cast %121 : vector<1x8x128xf32> to vector<8x128xf32>
    %123 = vector.broadcast %120 : f32 to vector<8x128xf32>
    %124 = arith.mulf %123, %122 : vector<8x128xf32>
    %125 = arith.addf %119, %124 : vector<8x128xf32>
    %c0_99 = arith.constant 0 : index
    %c10_100 = arith.constant 10 : index
    %126 = memref.load %arg1[%c0_99, %c10_100] : memref<2x18xf32, #tpu.memory_space<smem>>
    %c1_101 = arith.constant 1 : index
    %c0_102 = arith.constant 0 : index
    %c0_103 = arith.constant 0 : index
    %127 = vector.load %arg2[%c1_101, %c0_102, %c0_103] : memref<11x8x128xf32, #tpu.memory_space<vmem>>, vector<1x8x128xf32>
    %128 = vector.shape_cast %127 : vector<1x8x128xf32> to vector<8x128xf32>
    %129 = vector.broadcast %126 : f32 to vector<8x128xf32>
    %130 = arith.mulf %129, %128 : vector<8x128xf32>
    %131 = arith.addf %125, %130 : vector<8x128xf32>
    %c0_104 = arith.constant 0 : index
    %c11 = arith.constant 11 : index
    %132 = memref.load %arg1[%c0_104, %c11] : memref<2x18xf32, #tpu.memory_space<smem>>
    %c2_105 = arith.constant 2 : index
    %c0_106 = arith.constant 0 : index
    %c0_107 = arith.constant 0 : index
    %133 = vector.load %arg2[%c2_105, %c0_106, %c0_107] : memref<11x8x128xf32, #tpu.memory_space<vmem>>, vector<1x8x128xf32>
    %134 = vector.shape_cast %133 : vector<1x8x128xf32> to vector<8x128xf32>
    %135 = vector.broadcast %132 : f32 to vector<8x128xf32>
    %136 = arith.mulf %135, %134 : vector<8x128xf32>
    %137 = arith.addf %131, %136 : vector<8x128xf32>
    %c0_108 = arith.constant 0 : index
    %c12 = arith.constant 12 : index
    %138 = memref.load %arg1[%c0_108, %c12] : memref<2x18xf32, #tpu.memory_space<smem>>
    %c3_109 = arith.constant 3 : index
    %c0_110 = arith.constant 0 : index
    %c0_111 = arith.constant 0 : index
    %139 = vector.load %arg2[%c3_109, %c0_110, %c0_111] : memref<11x8x128xf32, #tpu.memory_space<vmem>>, vector<1x8x128xf32>
    %140 = vector.shape_cast %139 : vector<1x8x128xf32> to vector<8x128xf32>
    %141 = vector.broadcast %138 : f32 to vector<8x128xf32>
    %142 = arith.mulf %141, %140 : vector<8x128xf32>
    %143 = arith.addf %137, %142 : vector<8x128xf32>
    %c0_112 = arith.constant 0 : index
    %c13 = arith.constant 13 : index
    %144 = memref.load %arg1[%c0_112, %c13] : memref<2x18xf32, #tpu.memory_space<smem>>
    %c4_113 = arith.constant 4 : index
    %c0_114 = arith.constant 0 : index
    %c0_115 = arith.constant 0 : index
    %145 = vector.load %arg2[%c4_113, %c0_114, %c0_115] : memref<11x8x128xf32, #tpu.memory_space<vmem>>, vector<1x8x128xf32>
    %146 = vector.shape_cast %145 : vector<1x8x128xf32> to vector<8x128xf32>
    %147 = vector.broadcast %144 : f32 to vector<8x128xf32>
    %148 = arith.mulf %147, %146 : vector<8x128xf32>
    %149 = arith.addf %143, %148 : vector<8x128xf32>
    %c0_116 = arith.constant 0 : index
    %c14 = arith.constant 14 : index
    %150 = memref.load %arg1[%c0_116, %c14] : memref<2x18xf32, #tpu.memory_space<smem>>
    %c5_117 = arith.constant 5 : index
    %c0_118 = arith.constant 0 : index
    %c0_119 = arith.constant 0 : index
    %151 = vector.load %arg2[%c5_117, %c0_118, %c0_119] : memref<11x8x128xf32, #tpu.memory_space<vmem>>, vector<1x8x128xf32>
    %152 = vector.shape_cast %151 : vector<1x8x128xf32> to vector<8x128xf32>
    %153 = vector.broadcast %150 : f32 to vector<8x128xf32>
    %154 = arith.mulf %153, %152 : vector<8x128xf32>
    %155 = arith.addf %149, %154 : vector<8x128xf32>
    %c0_120 = arith.constant 0 : index
    %c15 = arith.constant 15 : index
    %156 = memref.load %arg1[%c0_120, %c15] : memref<2x18xf32, #tpu.memory_space<smem>>
    %c6_121 = arith.constant 6 : index
    %c0_122 = arith.constant 0 : index
    %c0_123 = arith.constant 0 : index
    %157 = vector.load %arg2[%c6_121, %c0_122, %c0_123] : memref<11x8x128xf32, #tpu.memory_space<vmem>>, vector<1x8x128xf32>
    %158 = vector.shape_cast %157 : vector<1x8x128xf32> to vector<8x128xf32>
    %159 = vector.broadcast %156 : f32 to vector<8x128xf32>
    %160 = arith.mulf %159, %158 : vector<8x128xf32>
    %161 = arith.addf %155, %160 : vector<8x128xf32>
    %c0_124 = arith.constant 0 : index
    %c16 = arith.constant 16 : index
    %162 = memref.load %arg1[%c0_124, %c16] : memref<2x18xf32, #tpu.memory_space<smem>>
    %c7_125 = arith.constant 7 : index
    %c0_126 = arith.constant 0 : index
    %c0_127 = arith.constant 0 : index
    %163 = vector.load %arg2[%c7_125, %c0_126, %c0_127] : memref<11x8x128xf32, #tpu.memory_space<vmem>>, vector<1x8x128xf32>
    %164 = vector.shape_cast %163 : vector<1x8x128xf32> to vector<8x128xf32>
    %165 = vector.broadcast %162 : f32 to vector<8x128xf32>
    %166 = arith.mulf %165, %164 : vector<8x128xf32>
    %167 = arith.addf %161, %166 : vector<8x128xf32>
    %c0_128 = arith.constant 0 : index
    %c17 = arith.constant 17 : index
    %168 = memref.load %arg1[%c0_128, %c17] : memref<2x18xf32, #tpu.memory_space<smem>>
    %c8_129 = arith.constant 8 : index
    %c0_130 = arith.constant 0 : index
    %c0_131 = arith.constant 0 : index
    %169 = vector.load %arg2[%c8_129, %c0_130, %c0_131] : memref<11x8x128xf32, #tpu.memory_space<vmem>>, vector<1x8x128xf32>
    %170 = vector.shape_cast %169 : vector<1x8x128xf32> to vector<8x128xf32>
    %171 = vector.broadcast %168 : f32 to vector<8x128xf32>
    %172 = arith.mulf %171, %170 : vector<8x128xf32>
    %173 = arith.addf %167, %172 : vector<8x128xf32>
    %c2_132 = arith.constant 2 : index
    %c0_133 = arith.constant 0 : index
    %c0_134 = arith.constant 0 : index
    %174 = vector.load %arg3[%c2_132, %c0_133, %c0_134] : memref<4x8x128xf32, #tpu.memory_space<vmem>>, vector<1x8x128xf32>
    %175 = vector.shape_cast %174 : vector<1x8x128xf32> to vector<8x128xf32>
    %176 = vector.shape_cast %173 : vector<8x128xf32> to vector<1x8x128xf32>
    tpu.vector_store %arg3[%c2_132, %c0_133, %c0_134], %176 {strides = array<i32>} : memref<4x8x128xf32, #tpu.memory_space<vmem>>, vector<1x8x128xf32>,
    %c10_135 = arith.constant 10 : index
    %c0_136 = arith.constant 0 : index
    %c0_137 = arith.constant 0 : index
    %177 = vector.load %arg2[%c10_135, %c0_136, %c0_137] : memref<11x8x128xf32, #tpu.memory_space<vmem>>, vector<1x8x128xf32>
    %178 = vector.shape_cast %177 : vector<1x8x128xf32> to vector<8x128xf32>
    %c1_138 = arith.constant 1 : index
    %c9_139 = arith.constant 9 : index
    %179 = memref.load %arg1[%c1_138, %c9_139] : memref<2x18xf32, #tpu.memory_space<smem>>
    %c0_140 = arith.constant 0 : index
    %c0_141 = arith.constant 0 : index
    %c0_142 = arith.constant 0 : index
    %180 = vector.load %arg2[%c0_140, %c0_141, %c0_142] : memref<11x8x128xf32, #tpu.memory_space<vmem>>, vector<1x8x128xf32>
    %181 = vector.shape_cast %180 : vector<1x8x128xf32> to vector<8x128xf32>
    %182 = vector.broadcast %179 : f32 to vector<8x128xf32>
    %183 = arith.mulf %182, %181 : vector<8x128xf32>
    %184 = arith.addf %178, %183 : vector<8x128xf32>
    %c1_143 = arith.constant 1 : index
    %c10_144 = arith.constant 10 : index
    %185 = memref.load %arg1[%c1_143, %c10_144] : memref<2x18xf32, #tpu.memory_space<smem>>
    %c1_145 = arith.constant 1 : index
    %c0_146 = arith.constant 0 : index
    %c0_147 = arith.constant 0 : index
    %186 = vector.load %arg2[%c1_145, %c0_146, %c0_147] : memref<11x8x128xf32, #tpu.memory_space<vmem>>, vector<1x8x128xf32>
    %187 = vector.shape_cast %186 : vector<1x8x128xf32> to vector<8x128xf32>
    %188 = vector.broadcast %185 : f32 to vector<8x128xf32>
    %189 = arith.mulf %188, %187 : vector<8x128xf32>
    %190 = arith.addf %184, %189 : vector<8x128xf32>
    %c1_148 = arith.constant 1 : index
    %c11_149 = arith.constant 11 : index
    %191 = memref.load %arg1[%c1_148, %c11_149] : memref<2x18xf32, #tpu.memory_space<smem>>
    %c2_150 = arith.constant 2 : index
    %c0_151 = arith.constant 0 : index
    %c0_152 = arith.constant 0 : index
    %192 = vector.load %arg2[%c2_150, %c0_151, %c0_152] : memref<11x8x128xf32, #tpu.memory_space<vmem>>, vector<1x8x128xf32>
    %193 = vector.shape_cast %192 : vector<1x8x128xf32> to vector<8x128xf32>
    %194 = vector.broadcast %191 : f32 to vector<8x128xf32>
    %195 = arith.mulf %194, %193 : vector<8x128xf32>
    %196 = arith.addf %190, %195 : vector<8x128xf32>
    %c1_153 = arith.constant 1 : index
    %c12_154 = arith.constant 12 : index
    %197 = memref.load %arg1[%c1_153, %c12_154] : memref<2x18xf32, #tpu.memory_space<smem>>
    %c3_155 = arith.constant 3 : index
    %c0_156 = arith.constant 0 : index
    %c0_157 = arith.constant 0 : index
    %198 = vector.load %arg2[%c3_155, %c0_156, %c0_157] : memref<11x8x128xf32, #tpu.memory_space<vmem>>, vector<1x8x128xf32>
    %199 = vector.shape_cast %198 : vector<1x8x128xf32> to vector<8x128xf32>
    %200 = vector.broadcast %197 : f32 to vector<8x128xf32>
    %201 = arith.mulf %200, %199 : vector<8x128xf32>
    %202 = arith.addf %196, %201 : vector<8x128xf32>
    %c1_158 = arith.constant 1 : index
    %c13_159 = arith.constant 13 : index
    %203 = memref.load %arg1[%c1_158, %c13_159] : memref<2x18xf32, #tpu.memory_space<smem>>
    %c4_160 = arith.constant 4 : index
    %c0_161 = arith.constant 0 : index
    %c0_162 = arith.constant 0 : index
    %204 = vector.load %arg2[%c4_160, %c0_161, %c0_162] : memref<11x8x128xf32, #tpu.memory_space<vmem>>, vector<1x8x128xf32>
    %205 = vector.shape_cast %204 : vector<1x8x128xf32> to vector<8x128xf32>
    %206 = vector.broadcast %203 : f32 to vector<8x128xf32>
    %207 = arith.mulf %206, %205 : vector<8x128xf32>
    %208 = arith.addf %202, %207 : vector<8x128xf32>
    %c1_163 = arith.constant 1 : index
    %c14_164 = arith.constant 14 : index
    %209 = memref.load %arg1[%c1_163, %c14_164] : memref<2x18xf32, #tpu.memory_space<smem>>
    %c5_165 = arith.constant 5 : index
    %c0_166 = arith.constant 0 : index
    %c0_167 = arith.constant 0 : index
    %210 = vector.load %arg2[%c5_165, %c0_166, %c0_167] : memref<11x8x128xf32, #tpu.memory_space<vmem>>, vector<1x8x128xf32>
    %211 = vector.shape_cast %210 : vector<1x8x128xf32> to vector<8x128xf32>
    %212 = vector.broadcast %209 : f32 to vector<8x128xf32>
    %213 = arith.mulf %212, %211 : vector<8x128xf32>
    %214 = arith.addf %208, %213 : vector<8x128xf32>
    %c1_168 = arith.constant 1 : index
    %c15_169 = arith.constant 15 : index
    %215 = memref.load %arg1[%c1_168, %c15_169] : memref<2x18xf32, #tpu.memory_space<smem>>
    %c6_170 = arith.constant 6 : index
    %c0_171 = arith.constant 0 : index
    %c0_172 = arith.constant 0 : index
    %216 = vector.load %arg2[%c6_170, %c0_171, %c0_172] : memref<11x8x128xf32, #tpu.memory_space<vmem>>, vector<1x8x128xf32>
    %217 = vector.shape_cast %216 : vector<1x8x128xf32> to vector<8x128xf32>
    %218 = vector.broadcast %215 : f32 to vector<8x128xf32>
    %219 = arith.mulf %218, %217 : vector<8x128xf32>
    %220 = arith.addf %214, %219 : vector<8x128xf32>
    %c1_173 = arith.constant 1 : index
    %c16_174 = arith.constant 16 : index
    %221 = memref.load %arg1[%c1_173, %c16_174] : memref<2x18xf32, #tpu.memory_space<smem>>
    %c7_175 = arith.constant 7 : index
    %c0_176 = arith.constant 0 : index
    %c0_177 = arith.constant 0 : index
    %222 = vector.load %arg2[%c7_175, %c0_176, %c0_177] : memref<11x8x128xf32, #tpu.memory_space<vmem>>, vector<1x8x128xf32>
    %223 = vector.shape_cast %222 : vector<1x8x128xf32> to vector<8x128xf32>
    %224 = vector.broadcast %221 : f32 to vector<8x128xf32>
    %225 = arith.mulf %224, %223 : vector<8x128xf32>
    %226 = arith.addf %220, %225 : vector<8x128xf32>
    %c1_178 = arith.constant 1 : index
    %c17_179 = arith.constant 17 : index
    %227 = memref.load %arg1[%c1_178, %c17_179] : memref<2x18xf32, #tpu.memory_space<smem>>
    %c8_180 = arith.constant 8 : index
    %c0_181 = arith.constant 0 : index
    %c0_182 = arith.constant 0 : index
    %228 = vector.load %arg2[%c8_180, %c0_181, %c0_182] : memref<11x8x128xf32, #tpu.memory_space<vmem>>, vector<1x8x128xf32>
    %229 = vector.shape_cast %228 : vector<1x8x128xf32> to vector<8x128xf32>
    %230 = vector.broadcast %227 : f32 to vector<8x128xf32>
    %231 = arith.mulf %230, %229 : vector<8x128xf32>
    %232 = arith.addf %226, %231 : vector<8x128xf32>
    %c3_183 = arith.constant 3 : index
    %c0_184 = arith.constant 0 : index
    %c0_185 = arith.constant 0 : index
    %233 = vector.load %arg3[%c3_183, %c0_184, %c0_185] : memref<4x8x128xf32, #tpu.memory_space<vmem>>, vector<1x8x128xf32>
    %234 = vector.shape_cast %233 : vector<1x8x128xf32> to vector<8x128xf32>
    %235 = vector.shape_cast %232 : vector<8x128xf32> to vector<1x8x128xf32>
    tpu.vector_store %arg3[%c3_183, %c0_184, %c0_185], %235 {strides = array<i32>} : memref<4x8x128xf32, #tpu.memory_space<vmem>>, vector<1x8x128xf32>,
    return
  }
  func.func @transform_0(%arg0: i32) -> (i32, i32) {
    %c0_i32 = arith.constant 0 : i32
    %c0_i32_0 = arith.constant 0 : i32
    %c0_i32_1 = arith.constant 0 : i32
    return %c0_i32, %c0_i32_0 : i32, i32
  }
  func.func @transform_1(%arg0: i32) -> (i32, i32, i32) {
    %c0_i32 = arith.constant 0 : i32
    %c0_i32_0 = arith.constant 0 : i32
    %c0_i32_1 = arith.constant 0 : i32
    return %c0_i32, %arg0, %c0_i32_0 : i32, i32, i32
  }
  func.func @transform_2(%arg0: i32) -> (i32, i32, i32) {
    %c0_i32 = arith.constant 0 : i32
    %c0_i32_0 = arith.constant 0 : i32
    %c0_i32_1 = arith.constant 0 : i32
    return %c0_i32, %arg0, %c0_i32_0 : i32, i32, i32
  }
}

</mosaic_0001>

<bundles_post_ra>
// kernel: tpu_custom_call.1
= control target key start
LH: loop header
LB: loop body
LE: loop exit
PB: predicated region body
PF: predicated region fallthrough
CT: control target
= control target key end

     0   :  { %7 = vsyncpa [#allocation5], 0  ;;  %s1123_s0 = inlined_call_operand.hbm [shape: f32[2,18], index: 0, kind: input, shape index: {}]   ;;  %s1124_s1 = inlined_call_operand.hbm [shape: f32[11,16,128], index: 1, kind: input, shape index: {}]   ;;  %s1125_s2 = inlined_call_operand.hbm [shape: f32[4,16,128], index: 2, kind: output, shape index: {}]  }
   0x1   :  { %8 = vsyncpa [#allocation3], 0 }
   0x2   :  { %10 = vsyncpa [#allocation3 + $0x1], 0 }
   0x3   :  { %11 = vsyncpa [#allocation4], 0 }
   0x4   :  { %13 = vsyncpa [#allocation4 + $0x1], 0  ;;  %s762_s9 = smov 0   ;;  %s764_s10 = smov 0  }
   0x5   :  { %s766_s11 = smov 0   ;;  %s768_s12 = smov 0  }
   0x6 LB: > { %s783_s13 = sadd.s32 4294967295, %s736_s12   ;;  %s472_s14 = sadd.s32 4294967294, %s736_s12   ;;  %s736_s12 = sphi %s768_s12, %s1145_s12   ;;  %s732_s11 = sphi %s766_s11, %s1144_s11   ;;  %s728_s10 = sphi %s764_s10, %s1143_s10   ;;  %s724_s9 = sphi %s762_s9, %s1142_s9  }
   0x7   : > { %s787_s15 = sadd.s32 1, %s736_s12   ;;  %s47_s16 = sadd.s32 1, %s732_s11 }
   0x8   : > { %s44_s17 = ssub.s32 %s736_s12, %s787_s15  ;;  %p54_p0 = scmp.ne.s32.totalorder %s732_s11, %s728_s10 }
   0x9   : > { %p45_p1 = scmp.eq.s32.totalorder %s44_s17, 0  ;;  %p55_p2 = scmp.eq.s32.totalorder %s736_s12, 0 }
   0xa   : > { %p60_p3 = scmp.ne.s32.totalorder %s728_s10, %s724_s9  ;;  %p1126_p4 = scmp.eq.s32.totalorder %s783_s13, 0 }
   0xb   : > { %s799_s18 = scalar_select %p45_p1, %s732_s11, %s47_s16  }
   0xc   : > { %p801_p5 = por %p55_p2, %p54_p0  ;;  %p807_p6 = por %p1126_p4, %p60_p3 }
   0xd   : > { %p84_p7 = scmp.eq.s32.totalorder %s783_s13, 1  ;;  %p90_p8 = scmp.eq.s32.totalorder %s472_s14, 1 }
   0xe   : > { %s1130_s20 = scalar_select %p807_p6, 1, 0 }
   0xf   : > { %p473_p9 = scmp.ge.s32.totalorder %s736_s12, 1  ;;  %p97_p10 = scmp.lt.s32.totalorder %s736_s12, 3 }
  0x10   : > { %p814_p11 = por %p84_p7, %p54_p0  ;;  %p818_p12 = por %p90_p8, %p60_p3 }
  0x11   : > { %p822_p13 = pnand %p473_p9, %p97_p10  ;;  %p581_p4 = scmp.lt.s32.totalorder %s736_s12, 2 }
  0x12   : > { %s1131_s21 = scalar_select %p814_p11, 1, 0 }
  0x13   : > { %s1132_s22 = scalar_select %p818_p12, 1, 0 }
  0x14   : > { %p568_p2 = pneg %p822_p13  ;;  %s119_s24 = sand.u32 1, %s732_s11  }
  0x15   : > { %s476_s25 = sshll.u32 %s736_s12, 7  ;;  %p1134_p6 = scmp.eq.s32.totalorder %s783_s13, 0 }
  0x16   : > { %p836_p7 = pnand %p581_p4, %p801_p5  ;;  %s558_s27 = smul.u32 88, %s119_s24 }
  0x17   : > { %p569_p0 = pnand %p568_p2, %p1134_p6  ;;  %s623_s30 = scalar_lea.hbm %s1123_s0, 32 }
  0x18   : > { %p624_p3 = scmp.ne.s32.totalorder %s1123_s0, %s623_s30  ;;  %p630_p6 = scmp.lt.u32.totalorder %s623_s30, %s1123_s0 }
  0x19   : > { %p625_p8 = pneg %p569_p0 }
  0x1b   : > { %p626_p9 = pnand %p625_p8, %p624_p3 }
  0x1d   : > { %p627_p10 = pneg %p626_p9 }
  0x1f   : > { %p632_p4 = pnand %p630_p6, %p627_p10 }
  0x21   : > { %635 = shalt.err (!%p632_p4)
}
  0x22   : > { %s738_s7 = smov [#allocation2]   ;;  %s855_s19 = scalar_lea.hbm %s1124_s1, %s476_s25 }
  0x23   : > { %571 = dma.hbm_to_smem (!%p569_p0), %s1123_s0, 32, %s738_s7, [#allocation5]  }
  0x24   : > { %s123_s28 = scalar_lea.vmem [#allocation6], %s558_s27  ;;  %s859_s30 = scalar_lea.sflag [#allocation3], %s119_s24 }
  0x25   : > { %s129_s29 = sshll.u32 %s123_s28, 4  ;;  %s636_s3 = scalar_lea.hbm %s855_s19, 1408  ;;  %s857_s29 = int_to_ptr.vmem [resolvable:$true] %s129_s29 }
  0x26   : > { %p637_p5 = scmp.ne.s32.totalorder %s855_s19, %s636_s3  ;;  %p638_p2 = pneg %p836_p7 }
  0x27   : > { %s641_s5 = scalar_lea.hbm %s1124_s1, 2816  ;;  %p642_p8 = scmp.lt.u32.totalorder %s855_s19, %s1124_s1 }
  0x28   : > { %p639_p0 = pnand %p638_p2, %p637_p5  ;;  %p643_p9 = scmp.lt.u32.totalorder %s641_s5, %s636_s3 }
  0x29   : > { %p645_p6 = scmp.lt.u32.totalorder %s636_s3, %s855_s19 }
  0x2a   : > { %p640_p3 = pneg %p639_p0  ;;  %p644_p10 = por %p643_p9, %p642_p8 }
  0x2c   : > { %p646_p4 = por %p645_p6, %p644_p10 }
  0x2e   : > { %p647_p1 = pnand %p646_p4, %p640_p3 }
  0x30   : > { %650 = shalt.err (!%p647_p1)
}
  0x31   : > { %s651_s24 = scalar_lea.vmem %s857_s29, 1408  ;;  %s739_s27 = smov [#allocation6]  }
  0x32   : > { %p652_p5 = scmp.ne.s32.totalorder %s857_s29, %s651_s24  ;;  %s656_s8 = sshll.u32 %s739_s27, 4  ;;  %s657_s8 = int_to_ptr.vmem [resolvable:$false] %s656_s8 }
  0x33   : > { %s658_s14 = scalar_lea.vmem %s657_s8, 2816  ;;  %p659_p11 = scmp.lt.s32.totalorder %s857_s29, %s657_s8 }
  0x34   : > { %p654_p0 = pnand %p652_p5, %p638_p2  ;;  %p660_p8 = scmp.lt.s32.totalorder %s658_s14, %s651_s24 }
  0x36   : > { %p655_p12 = pneg %p654_p0  ;;  %p661_p9 = por %p660_p8, %p659_p11 }
  0x38   : > { %p662_p10 = pnand %p661_p9, %p655_p12 }
  0x3a   : > { %665 = shalt.err (!%p662_p10)
}
  0x3b   : > { %s740_s16 = smov 256   ;;  %s741_s17 = smov 128  }
  0x3c   : > { %s742_s28 = smov 8   ;;  %141 = sbr.rel (%p822_p13) target bundleno = 134 (0x86), region = 28 }
  0x3d   : > { %575 = dma.hbm_to_vmem [thread:$0]  (!%p836_p7), %s855_s19, 1408, %s857_s29, %s859_s30, %s740_s16, %s741_s17, %s742_s28  }
  0x3e   : > { %p1136_p1 = scmp.eq.s32.totalorder (!%p822_p13), %s783_s13, 0 }
  0x43   : > { %711 = dma.done.wait (%p1136_p1), [#allocation5], 32   ;;  %p1137_p2 = pmov %p1136_p1 }
  0x44   : > { %s894_s3 = sand.u32 1, %s728_s10   ;;  %p1138_p11 = scmp.ne.s32.totalorder %s1130_s20, 0 }
  0x45   : > { %713 = vsyncadd (%p1137_p2), [#allocation5], 4294967264  ;;  %s559_s25 = smul.u32 88, %s894_s3  ;;  %s148_s4 = scalar_lea.sflag [#allocation3], %s894_s3 }
  0x47   : > { %s898_s5 = scalar_lea.vmem [#allocation6], %s559_s25 }
  0x48   : > { %715 = dma.done.wait (%p1138_p11), %s148_s4, 1408  }
  0x49   : > { %717 = vsyncadd (%p1138_p11), %s148_s4, 4294965888 }
  0x4a   : > { %156 = sfence }
  0x4b   : > { %s175_s23 = sld [smem:[#allocation2]]  ;;  %s481_s26 = sld [smem:[#allocation2 + $0x1]]  ;;  %v911_v0 = vld [vmem:[%s898_s5] sm:$0xff]  ;;  %v918_v1 = vld [vmem:[%s898_s5 + $0x8] sm:$0xff]  ;;  %v924_v4 = vld [vmem:[%s898_s5 + $0x10] sm:$0xff] }
  0x4c   : > { %s483_s19 = sld [smem:[#allocation2 + $0x2]]  ;;  %s904_s29 = sld [smem:[#allocation2 + $0x3]]  ;;  %v480_v2 = vld [vmem:[%s898_s5 + $0x48] sm:$0xff]  ;;  %v935_v9 = vld [vmem:[%s898_s5 + $0x18] sm:$0xff]  ;;  %v939_v11 = vld [vmem:[%s898_s5 + $0x20] sm:$0xff] }
  0x4d   : > { %s906_s30 = sld [smem:[#allocation2 + $0x4]]  ;;  %s908_s6 = sld [smem:[#allocation2 + $0x5]]  ;;  %v958_v18 = vld [vmem:[%s898_s5 + $0x28] sm:$0xff]  ;;  %v961_v19 = vld [vmem:[%s898_s5 + $0x30] sm:$0xff]  ;;  %v976_v25 = vld [vmem:[%s898_s5 + $0x38] sm:$0xff] }
  0x4e   : > { %s913_s20 = sld [smem:[#allocation2 + $0x6]]  ;;  %s915_s7 = sld [smem:[#allocation2 + $0x7]]  ;;  %v979_v26 = vld [vmem:[%s898_s5 + $0x40] sm:$0xff]  ;;  %v516_v46 = vld [vmem:[%s898_s5 + $0x50] sm:$0xff] }
  0x4f   : > { %s920_s24 = sld [smem:[#allocation2 + $0x8]]  ;;  %s929_s8 = sld [smem:[#allocation2 + $0x81]] }
  0x50   : > { %s926_s27 = sld [smem:[#allocation2 + $0x80]]  ;;  %s931_s14 = sld [smem:[#allocation2 + $0x82]] }
  0x51   : > { %v177_v3 = vstv %s175_s23  ;;  %v183_v6 = vstv %s481_s26  ;;  %s941_s16 = sld [smem:[#allocation2 + $0x83]]  ;;  %s943_s17 = sld [smem:[#allocation2 + $0x84]] }
  0x52   : > { %v178_v5 = vmul.f32 %v177_v3, %v911_v0  ;;  %v184_v7 = vmul.f32 %v918_v1, %v183_v6  ;;  %v189_v8 = vstv %s483_s19  ;;  %v195_v10 = vstv %s904_s29  ;;  %s947_s28 = sld [smem:[#allocation2 + $0x85]]  ;;  %s949_s25 = sld [smem:[#allocation2 + $0x86]] }
  0x53   : > { %v190_v13 = vmul.f32 %v924_v4, %v189_v8  ;;  %v201_v14 = vstv %s906_s30  ;;  %s951_s4 = sld [smem:[#allocation2 + $0x87]]  ;;  %s953_s23 = sld [smem:[#allocation2 + $0x88]]  ;;  %v196_v16 = vmul.f32 %v935_v9, %v195_v10  ;;  %v207_v20 = vstv %s908_s6 }
  0x54   : > { %v179_v12 = vadd.f32 %v480_v2, %v178_v5  ;;  %v202_v17 = vmul.f32 %v939_v11, %v201_v14  ;;  %s963_s26 = sld [smem:[#allocation2 + $0x9]]  ;;  %s965_s19 = sld [smem:[#allocation2 + $0xa]]  ;;  %v213_v21 = vstv %s913_s20  ;;  %v219_v22 = vstv %s915_s7 }
  0x55   : > { %s971_s29 = sld [smem:[#allocation2 + $0xb]]  ;;  %s973_s30 = sld [smem:[#allocation2 + $0xc]]  ;;  %v225_v27 = vstv %s920_s24  ;;  %v237_v29 = vstv %s929_s8  ;;  %v208_v35 = vmul.f32 %v958_v18, %v207_v20  ;;  %v214_v38 = vmul.f32 %v961_v19, %v213_v21 }
  0x56   : > { %v185_v15 = vadd.f32 %v184_v7, %v179_v12  ;;  %v232_v23 = vstv %s926_s27  ;;  %v238_v30 = vmul.f32 %v918_v1, %v237_v29  ;;  %v242_v31 = vstv %s931_s14  ;;  %s988_s6 = sld [smem:[#allocation2 + $0xd]]  ;;  %s996_s20 = sld [smem:[#allocation2 + $0xe]] }
  0x57   : > { %v233_v28 = vmul.f32 %v232_v23, %v911_v0  ;;  %v247_v32 = vstv %s941_s16  ;;  %v252_v33 = vstv %s943_s17  ;;  %v243_v37 = vmul.f32 %v924_v4, %v242_v31  ;;  %s998_s7 = sld [smem:[#allocation2 + $0x89]]  ;;  %s1003_s24 = sld [smem:[#allocation2 + $0xf]] }
  0x58   : > { %v191_v24 = vadd.f32 %v190_v13, %v185_v15  ;;  %v220_v39 = vmul.f32 %v976_v25, %v219_v22  ;;  %v226_v40 = vmul.f32 %v979_v26, %v225_v27  ;;  %v257_v41 = vstv %s947_s28  ;;  %s1009_s27 = sld [smem:[#allocation2 + $0x8a]]  ;;  %s1011_s8 = sld [smem:[#allocation2 + $0x8b]] }
  0x59   : > { %v234_v36 = vadd.f32 %v480_v2, %v233_v28  ;;  %v248_v44 = vmul.f32 %v935_v9, %v247_v32  ;;  %v253_v45 = vmul.f32 %v939_v11, %v252_v33  ;;  %v262_v47 = vstv %s949_s25  ;;  %s1019_s5 = sld [smem:[#allocation2 + $0x10]]  ;;  %s1021_s14 = sld [smem:[#allocation2 + $0x8c]] }
  0x5a   : > { %v197_v34 = vadd.f32 %v196_v16, %v191_v24  ;;  %v267_v48 = vstv %s951_s4  ;;  %v281_v49 = vstv %s963_s26  ;;  %v286_v50 = vstv %s965_s19  ;;  %s479_s16 = sshll.u32 %s894_s3, 5  ;;  %s1025_s17 = sld [smem:[#allocation2 + $0x8d]] }
  0x5b   : > { %v239_v43 = vadd.f32 %v238_v30, %v234_v36  ;;  %v258_v53 = vmul.f32 %v958_v18, %v257_v41  ;;  %v282_v54 = vmul.f32 %v281_v49, %v911_v0  ;;  %v272_v55 = vstv %s953_s23  ;;  %s1029_s28 = sld [smem:[#allocation2 + $0x11]]  ;;  %s1032_s25 = sld [smem:[#allocation2 + $0x8e]] }
  0x5c   : > { %v203_v42 = vadd.f32 %v202_v17, %v197_v34  ;;  %v287_v56 = vmul.f32 %v918_v1, %v286_v50  ;;  %v291_v57 = vstv %s971_s29  ;;  %v296_v58 = vstv %s973_s30  ;;  %s1039_s4 = sld [smem:[#allocation2 + $0x8f]]  ;;  %s1045_s23 = scalar_lea.vmem [#allocation7], %s479_s16 }
  0x5d   : > { %v244_v52 = vadd.f32 %v243_v37, %v239_v43  ;;  %v283_v61 = vadd.f32 %v516_v46, %v282_v54  ;;  %v292_v62 = vmul.f32 %v924_v4, %v291_v57  ;;  %v263_v63 = vmul.f32 %v961_v19, %v262_v47  ;;  %s1050_s26 = sld [smem:[#allocation2 + $0x90]]  ;;  %s551_s19 = sld [smem:[#allocation2 + $0x91]] }
  0x5e   : > { %v209_v51 = vadd.f32 %v208_v35, %v203_v42  ;;  %v301_v2 = vstv %s988_s6  ;;  %v297_v7 = vmul.f32 %v935_v9, %v296_v58  ;;  %v268_v8 = vmul.f32 %v976_v25, %v267_v48  ;;  %s387_s29 = sshll.u32 %s1045_s23, 4  ;;  %s555_s30 = sshll.u32 %s783_s13, 7  ;;  %s1073_s29 = int_to_ptr.vmem [resolvable:$true] %s387_s29 }
  0x5f   : > { %v249_v60 = vadd.f32 %v248_v44, %v244_v52  ;;  %v288_v6 = vadd.f32 %v287_v56, %v283_v61  ;;  %v273_v10 = vmul.f32 %v979_v26, %v272_v55  ;;  %v306_v12 = vstv %s996_s20  ;;  %p1139_p13 = scmp.ne.s32.totalorder %s1131_s21, 0  ;;  %s743_s13 = smov [#allocation7]  }
  0x60   : > { %v215_v59 = vadd.f32 %v214_v38, %v209_v51  ;;  %v329_v13 = vstv %s998_s7  ;;  %v302_v17 = vmul.f32 %v939_v11, %v301_v2  ;;  %v311_v20 = vstv %s1003_s24  ;;  %s1078_s7 = scalar_lea.hbm %s1125_s2, %s555_s30  ;;  %s375_s24 = scalar_lea.sflag [#allocation4], %s894_s3 }
  0x61   : > { %v254_v5 = vadd.f32 %v253_v45, %v249_v60  ;;  %v293_v16 = vadd.f32 %v292_v62, %v288_v6  ;;  %v330_v21 = vmul.f32 %v329_v13, %v911_v0  ;;  %v334_v22 = vstv %s1009_s27  ;;  %s666_s27 = scalar_lea.vmem %s1073_s29, 512 }
  0x62   : > { %v221_v3 = vadd.f32 %v220_v39, %v215_v59  ;;  %v339_v23 = vstv %s1011_s8  ;;  %v307_v28 = vmul.f32 %v958_v18, %v306_v12  ;;  %v335_v29 = vmul.f32 %v918_v1, %v334_v22  ;;  %p667_p12 = scmp.ne.s32.totalorder %s1073_s29, %s666_s27  ;;  %s670_s8 = sshll.u32 %s743_s13, 4  ;;  %s671_s8 = int_to_ptr.vmem [resolvable:$false] %s670_s8 }
  0x63   : > { %v259_v15 = vadd.f32 %v258_v53, %v254_v5  ;;  %v298_v27 = vadd.f32 %v297_v7, %v293_v16  ;;  %v316_v30 = vstv %s1019_s5  ;;  %v331_v31 = vadd.f32 %v516_v46, %v330_v21  ;;  %s672_s5 = scalar_lea.vmem %s671_s8, 1024  ;;  %p673_p6 = scmp.lt.s32.totalorder %s1073_s29, %s671_s8 }
  0x64   : > { %v227_v14 = vadd.f32 %v226_v40, %v221_v3  ;;  %v340_v0 = vmul.f32 %v924_v4, %v339_v23  ;;  %v344_v32 = vstv %s1021_s14  ;;  %v312_v35 = vmul.f32 %v961_v19, %v311_v20  ;;  %p668_p7 = pnand %p667_p12, %p1139_p13  ;;  %p674_p4 = scmp.lt.s32.totalorder %s672_s5, %s666_s27 }
  0x65   : > { %v264_v24 = vadd.f32 %v263_v63, %v259_v15  ;;  %v303_v34 = vadd.f32 %v302_v17, %v298_v27  ;;  %v349_v36 = vstv %s1025_s17  ;;  %v321_v37 = vstv %s1029_s28 }
  0x66   : > { %228 = vst [vmem:[%s1045_s23] sm:$0xff] %v227_v14  ;;  %v336_v38 = vadd.f32 %v335_v29, %v331_v31  ;;  %v345_v1 = vmul.f32 %v935_v9, %v344_v32  ;;  %v317_v41 = vmul.f32 %v976_v25, %v316_v30  ;;  %v354_v42 = vstv %s1032_s25  ;;  %p669_p3 = pneg %p668_p7  ;;  %p675_p5 = por %p674_p4, %p673_p6 }
  0x67   : > { %v269_v33 = vadd.f32 %v268_v8, %v264_v24  ;;  %v308_v40 = vadd.f32 %v307_v28, %v303_v34  ;;  %v350_v43 = vmul.f32 %v939_v11, %v349_v36  ;;  %v322_v45 = vmul.f32 %v979_v26, %v321_v37 }
  0x68   : > { %v341_v4 = vadd.f32 %v340_v0, %v336_v38  ;;  %v359_v46 = vstv %s1039_s4  ;;  %v355_v48 = vmul.f32 %v958_v18, %v354_v42  ;;  %v364_v49 = vstv %s1050_s26  ;;  %p676_p0 = pnand %p675_p5, %p669_p3 }
  0x69   : > { %v274_v39 = vadd.f32 %v273_v10, %v269_v33  ;;  %v313_v44 = vadd.f32 %v312_v35, %v308_v40  ;;  %v360_v51 = vmul.f32 %v961_v19, %v359_v46  ;;  %v369_v53 = vstv %s551_s19 }
  0x6a   : > { %v346_v47 = vadd.f32 %v345_v1, %v341_v4  ;;  %v365_v54 = vmul.f32 %v976_v25, %v364_v49  ;;  %v370_v56 = vmul.f32 %v979_v26, %v369_v53 }
  0x6b   : > { %515 = vst [vmem:[%s1045_s23 + $0x8] sm:$0xff] %v274_v39  ;;  %v318_v9 = vadd.f32 %v317_v41, %v313_v44 }
  0x6c   : > { %v351_v50 = vadd.f32 %v350_v43, %v346_v47 }
  0x6d   : > { %v323_v52 = vadd.f32 %v322_v45, %v318_v9 }
  0x6e   : > { %v356_v11 = vadd.f32 %v355_v48, %v351_v50 }
  0x6f   : > { %534 = vst [vmem:[%s1045_s23 + $0x10] sm:$0xff] %v323_v52 }
  0x70   : > { %v361_v55 = vadd.f32 %v360_v51, %v356_v11 }
  0x72   : > { %v366_v18 = vadd.f32 %v365_v54, %v361_v55 }
  0x74   : > { %v371_v19 = vadd.f32 %v370_v56, %v366_v18 }
  0x76   : > { %553 = vst [vmem:[%s1045_s23 + $0x18] sm:$0xff] %v371_v19 }
  0x77   : > { %679 = shalt.err (!%p676_p0)
}
  0x78   : > { %s680_s14 = scalar_lea.hbm %s1078_s7, 512  ;;  %s684_s28 = scalar_lea.hbm %s1125_s2, 1024 }
  0x79   : > { %p681_p8 = scmp.ne.s32.totalorder %s1078_s7, %s680_s14  ;;  %p685_p1 = scmp.lt.u32.totalorder %s1078_s7, %s1125_s2 }
  0x7a   : > { %p686_p2 = scmp.lt.u32.totalorder %s684_s28, %s680_s14  ;;  %p688_p12 = scmp.lt.u32.totalorder %s680_s14, %s1078_s7 }
  0x7b   : > { %p682_p9 = pnand %p681_p8, %p1139_p13 }
  0x7c   : > { %p687_p11 = por %p686_p2, %p685_p1 }
  0x7d   : > { %p683_p10 = pneg %p682_p9 }
  0x7e   : > { %p689_p7 = por %p688_p12, %p687_p11 }
  0x80   : > { %p690_p3 = pnand %p689_p7, %p683_p10 }
  0x82   : > { %693 = shalt.err (!%p690_p3)
}
  0x83   : > { %s744_s23 = smov 128   ;;  %s745_s26 = smov 256  }
  0x84   : > { %s746_s19 = smov 8  }
  0x85   : > { %566 = dma.vmem_to_hbm [thread:$0]  (%p1139_p13), %s1073_s29, 512, %s1078_s7, %s375_s24, %s744_s23, %s745_s26, %s746_s19  }
  0x86 PF: > { %s402_s30 = sand.u32 1, %s724_s9   ;;  %p1140_p6 = scmp.ne.s32.totalorder %s1132_s22, 0 }
  0x87   : > { %p1141_p4 = scmp.ge.s32.totalorder %s736_s12, 2  ;;  %s403_s6 = scalar_lea.sflag [#allocation4], %s402_s30 }
  0x89   : > { %p577_p5 = pnand %p1141_p4, %p1140_p6 }
  0x8b   : > { %719 = dma.done.wait (!%p577_p5), %s403_s6, 512  }
  0x8c   : > { %721 = vsyncadd (!%p577_p5), %s403_s6, 4294966784  ;;  %p16_p0 = scmp.ge.s32.totalorder %s787_s15, 4   ;;  %s1142_s9 = smov %s728_s10 }
  0x8d   : > { %s1143_s10 = smov %s732_s11  ;;  %s1144_s11 = smov %s799_s18 }
  0x8e   : > { %s1145_s12 = smov %s787_s15  ;;  %18 = sbr.rel (!%p16_p0) target bundleno = 6 (0x6), region = 91 }
  0x95   :  { %408 = vsyncpa [#allocation3], 1 }
  0x96   :  { %410 = vsyncpa [#allocation3 + $0x1], 1 }
  0x97   :  { %411 = vsyncpa [#allocation4], 1 }
  0x98   :  { %413 = vsyncpa [#allocation4 + $0x1], 1 }
  0x99   :  { %414 = vsyncpa [#allocation5], 1 }
  0x9a   :  { %416 = vsyncpa [#allocation5 + $0x1], 1 }

</bundles_post_ra>
